<compile_context>
chip_gen: v7x
topology: tpu7x:2x2x1
jax: 0.10.0
libtpu: 0.0.40
codegen_flags: <defaults>
</compile_context>

<pallas_src>
import jax
import jax.numpy as jnp
from jax.experimental import pallas as pl
from jax.experimental.pallas import tpu as pltpu

_VMEM_LIMIT = 32 * 1024 * 1024  # safe on v5e/v6e (128 MiB phys) and v7x (64 MiB phys)


def _round_up(x, m):
    return (x + m - 1) // m * m


def _pick_tile(dim, candidates):
    padded = _round_up(dim, 128)
    for c in candidates:
        if padded % c == 0:
            return c
    return 128


# ----------------------------------------------------------------------------
# Kernel 1: bias-free linear projection (nn.Linear(feat_dim, embed_dim, bias=False))
# Tiled MXU matmul: grid (M/tm, N/tn, K/tk), f32 accumulator scratch.
# ----------------------------------------------------------------------------
def _proj_kernel(x_ref, w_ref, o_ref, acc_ref):
    @pl.when(pl.program_id(2) == 0)
    def _():
        acc_ref[...] = jnp.zeros_like(acc_ref)

    acc_ref[...] += jnp.dot(
        x_ref[...], w_ref[...], preferred_element_type=jnp.float32
    )

    @pl.when(pl.program_id(2) == pl.num_programs(2) - 1)
    def _():
        o_ref[...] = acc_ref[...].astype(o_ref.dtype)


def project_entity_features(ent_pkl, w_proj_t, d_pad):
    """(Nf, F) @ (F, D) -> (Nf, d_pad) f32; output lanes zero-padded to d_pad."""
    Nf, F = ent_pkl.shape
    D = w_proj_t.shape[1]
    assert d_pad % 128 == 0 and d_pad >= D

    tm = min(256, _round_up(Nf, 16))        # sublane tile (mult of 16: bf16 inputs)
    tk = _pick_tile(F, (512, 256, 128))     # contraction tile
    tn = _pick_tile(d_pad, (256, 128))      # output-lane tile
    Mp = _round_up(Nf, tm)
    Fp = _round_up(F, tk)
    Dp = _round_up(d_pad, tn)               # == d_pad (tn divides d_pad)

    # zero-pad to tile multiples; bf16 MXU inputs, f32 accumulation in-kernel.
    x = jnp.pad(ent_pkl, ((0, Mp - Nf), (0, Fp - F))).astype(jnp.bfloat16)
    w = jnp.pad(w_proj_t, ((0, Fp - F), (0, Dp - D))).astype(jnp.bfloat16)

    out = pl.pallas_call(
        _proj_kernel,
        out_shape=jax.ShapeDtypeStruct((Mp, Dp), jnp.float32),
        grid_spec=pltpu.PrefetchScalarGridSpec(
            num_scalar_prefetch=0,
            grid=(Mp // tm, Dp // tn, Fp // tk),
            in_specs=[
                pl.BlockSpec((tm, tk), lambda i, j, k: (i, k)),
                pl.BlockSpec((tk, tn), lambda i, j, k: (k, j)),
            ],
            out_specs=pl.BlockSpec((tm, tn), lambda i, j, k: (i, j)),
            scratch_shapes=[pltpu.VMEM((tm, tn), jnp.float32)],
        ),
        compiler_params=pltpu.CompilerParams(
            dimension_semantics=("parallel", "parallel", "arbitrary"),
            vmem_limit_bytes=_VMEM_LIMIT,
        ),
    )(x, w)
    return out[:Nf, :d_pad]


# ----------------------------------------------------------------------------
# Kernel 2 (prologue): L2-normalize each query token and sum over tokens.
# Hoisted out of the candidate loop so it runs once per forward, not per tile.
# ----------------------------------------------------------------------------
def _qsum_kernel(q_ref, o_ref):
    # q_ref: (B, T, Dp) f32 gathered query embeddings ; o_ref: (B, Dp) f32
    q = q_ref[...].astype(jnp.float32)
    ssq = jnp.sum(q * q, axis=-1, keepdims=True)
    # F.normalize(dim=-1): x / max(||x||_2, 1e-12) == x * rsqrt(max(ssq, 1e-24))
    q = q * jax.lax.rsqrt(jnp.maximum(ssq, 1e-24))
    o_ref[...] = jnp.sum(q, axis=1)


def query_normalize_sum(query_emb):
    B, T, Dp = query_emb.shape
    # TODO(synk): tile over B for very large batches (single block is fine here).
    return pl.pallas_call(
        _qsum_kernel,
        out_shape=jax.ShapeDtypeStruct((B, Dp), jnp.float32),
        in_specs=[pl.BlockSpec((B, T, Dp), lambda: (0, 0, 0))],
        out_specs=pl.BlockSpec((B, Dp), lambda: (0, 0)),
    )(query_emb)


# ----------------------------------------------------------------------------
# Kernel 3: -L1 distance scores, tiled over the candidate axis.
#   q_ref: (Dp, B)  f32  -- normalized+summed queries (resident, loaded once)
#   t_ref: (Dp, ET) bf16 -- candidate tile, candidates on the lane axis
#   o_ref: (B, ET)  f32  -- lane-dense score tile
# Per-query loop + sublane reduce avoids materializing a (B, ET, Dp) broadcast
# and needs no transposes inside the kernel.
# ----------------------------------------------------------------------------
def _score_kernel(q_ref, t_ref, o_ref):
    t = t_ref[...].astype(jnp.float32)          # upcast the bf16 stream (VPU)
    q = q_ref[...]                              # (Dp, B) f32, tiny & resident
    num_queries = q.shape[1]                    # static
    for b in range(num_queries):
        qb = q[:, b:b + 1]                      # (Dp, 1), broadcast along lanes
        # score[b, e] = -sum_d |q_sum[b, d] - cand[e, d]|
        o_ref[pl.ds(b, 1), :] = -jnp.sum(jnp.abs(t - qb), axis=0, keepdims=True)


def blp_score(q_sum_t, cand_t, *, e_tile):
    Dp, B = q_sum_t.shape
    E_pad = cand_t.shape[1]
    assert E_pad % e_tile == 0
    return pl.pallas_call(
        _score_kernel,
        out_shape=jax.ShapeDtypeStruct((B, E_pad), jnp.float32),
        grid_spec=pltpu.PrefetchScalarGridSpec(
            num_scalar_prefetch=0,
            grid=(E_pad // e_tile,),
            in_specs=[
                pl.BlockSpec((Dp, B), lambda e: (0, 0)),        # resident queries
                pl.BlockSpec((Dp, e_tile), lambda e: (0, e)),   # streamed candidates
            ],
            out_specs=pl.BlockSpec((B, e_tile), lambda e: (0, e)),
        ),
        compiler_params=pltpu.CompilerParams(
            dimension_semantics=("parallel",),                  # shards across TCs on v7x
            vmem_limit_bytes=_VMEM_LIMIT,
        ),
    )(q_sum_t, cand_t)


# ----------------------------------------------------------------------------
# BLP forward (predict_type='ent', target_ent_index=None, use_neg=False)
# ----------------------------------------------------------------------------
def blp_forward(params, batch_input_ids, batch_mask_pos, num_ent):
    other_emb = params["other_emb"]
    D = other_emb.shape[1]
    Dp = _round_up(D, 128)

    # load_unity_emd: project entity features and splice into the full table.
    ent_emb_file = project_entity_features(params["ent_pkl"], params["w_proj_t"], Dp)
    other_pad = jnp.pad(other_emb, ((0, 0), (0, Dp - D)))
    unity_embeddings = jnp.concatenate(
        [other_pad[0:1], ent_emb_file, other_pad[1:]], axis=0
    )  # (total, Dp) f32
    # TODO(synk): for large tables, write the projection output in place via
    # input_output_aliases instead of re-concatenating the whole table each call.

    # query_input = cat([ids[:, :mask_pos], ids[:, mask_pos+1:3]], dim=1) -> (B, 2)
    # (batch_mask_pos must be a static Python int, as in the PyTorch .item() path)
    query_input = jnp.concatenate(
        [batch_input_ids[:, :batch_mask_pos],
         batch_input_ids[:, batch_mask_pos + 1:3]],
        axis=1,
    )
    query_emb = unity_embeddings[query_input]            # (B, 2, Dp) gather (glue)
    # TODO(synk): optionally fuse this gather into the score kernel with
    # PrefetchScalarGridSpec(num_scalar_prefetch=1) + pl.Element row indexing.

    # hoisted normalize + sum (Pallas prologue), transposed for the score kernel
    q_sum = query_normalize_sum(query_emb)               # (B, Dp) f32
    q_sum_t = q_sum.T                                    # (Dp, B)

    # predict_type == 'ent': candidates are the first num_ent+1 embeddings.
    # Pad candidates to a 128-multiple (lane-dense output), stream in bf16,
    # transposed so candidates sit on the lane axis.
    E = num_ent + 1
    e_tile = min(512, _round_up(E, 128))
    E_pad = _round_up(E, e_tile)
    cand = unity_embeddings[:E]
    cand_t = jnp.pad(cand, ((0, E_pad - E), (0, 0))).astype(jnp.bfloat16).T  # (Dp, E_pad)

    scores = blp_score(q_sum_t, cand_t, e_tile=e_tile)   # (B, E_pad)
    return scores[:, :E]


# ----------------------------------------------------------------------------
# Pure-JAX reference (f32) for a tolerance check.
# ----------------------------------------------------------------------------
def _reference_forward(params, batch_input_ids, batch_mask_pos, num_ent):
    ent_emb = params["ent_pkl"] @ params["w_proj_t"]
    unity = jnp.concatenate(
        [params["other_emb"][0:1], ent_emb, params["other_emb"][1:]], axis=0
    )
    qi = jnp.concatenate(
        [batch_input_ids[:, :batch_mask_pos],
         batch_input_ids[:, batch_mask_pos + 1:3]],
        axis=1,
    )
    q = unity[qi]
    norm = jnp.sqrt(jnp.sum(q * q, axis=-1, keepdims=True))
    q = q / jnp.maximum(norm, 1e-12)
    q_sum = jnp.sum(q, axis=1)
    cand = unity[: num_ent + 1]
    return -jnp.sum(jnp.abs(q_sum[:, None, :] - cand[None, :, :]), axis=-1)


if __name__ == "__main__":
    # Small synthetic config (Namespace equivalent)
    num_ent = 15
    num_rel = 4
    embed_dim = 32
    feat_dim = 16
    num_feat_ent = 10                      # rows of ent_pkl (pretrained entity features)
    total_emb = num_ent + num_rel + 3      # 22
    num_other = total_emb - num_feat_ent   # 12
    B, seq_len = 2, 8
    batch_mask_pos = 1

    key = jax.random.PRNGKey(0)
    k1, k2, k3, k4 = jax.random.split(key, 4)

    params = {
        # pretrained entity features fed to the projection layer
        "ent_pkl": jax.random.normal(k1, (num_feat_ent, feat_dim), jnp.float32),
        # nn.Linear(feat_dim, embed_dim, bias=False).weight is (D, F); store W^T = (F, D)
        "w_proj_t": jax.random.normal(k2, (feat_dim, embed_dim), jnp.float32)
        * (1.0 / jnp.sqrt(feat_dim)),
        # remaining learned embeddings (xavier-style scale)
        "other_emb": jax.random.normal(k3, (num_other, embed_dim), jnp.float32)
        * (1.0 / jnp.sqrt(embed_dim)),
    }

    batch_input_ids = jax.random.randint(
        k4, (B, seq_len), minval=0, maxval=total_emb, dtype=jnp.int32
    )

    score = blp_forward(params, batch_input_ids, batch_mask_pos, num_ent)
    score = jax.block_until_ready(score)
    assert score.shape == (B, num_ent + 1), score.shape

    # tolerance check vs f32 reference (kernels stream candidates / MXU inputs in bf16)
    ref = _reference_forward(params, batch_input_ids, batch_mask_pos, num_ent)
    assert bool(jnp.allclose(score, ref, rtol=5e-2, atol=1.0)), (
        float(jnp.max(jnp.abs(score - ref)))
    )

    # TODO(synk): TransLoss (training loss) and the predict_type!='ent' / use_neg
    # negative-sampling branches have no forward-pass role here; not implemented.
    print("KERNEL_OK")
</pallas_src>

<mosaic_0001>
module attributes {stable_mosaic.version = 11 : i64} {
  func.func @_proj_kernel(%arg0: i32, %arg1: i32, %arg2: i32, %arg3: memref<16x128xbf16, #tpu.memory_space<vmem>>, %arg4: memref<128x128xbf16, #tpu.memory_space<vmem>>, %arg5: memref<16x128xf32, #tpu.memory_space<vmem>>, %arg6: memref<16x128xf32, #tpu.memory_space<vmem>>) attributes {dimension_semantics = [#tpu.dimension_semantics<parallel>, #tpu.dimension_semantics<parallel>, #tpu.dimension_semantics<arbitrary>], iteration_bounds = array<i64: 1, 1, 1>, scalar_prefetch = 0 : i64, scratch_operands = 1 : i64, tpu.core_type = #tpu.core_type<tc>, window_params = [{transform_indices = @transform_0, window_bounds = array<i64: 16, 128>}, {transform_indices = @transform_1, window_bounds = array<i64: 128, 128>}, {transform_indices = @transform_2, window_bounds = array<i64: 16, 128>}]} {
    %c0_i32 = arith.constant 0 : i32
    %0 = arith.cmpi eq, %arg2, %c0_i32 : i32
    %1 = arith.extui %0 : i1 to i32
    %c0_i32_0 = arith.constant 0 : i32
    %2 = arith.cmpi ne, %1, %c0_i32_0 : i32
    scf.if %2 {
      %cst_10 = arith.constant 0.000000e+00 : f32
      %12 = vector.broadcast %cst_10 : f32 to vector<16x128xf32>
      %c0_11 = arith.constant 0 : index
      %c0_12 = arith.constant 0 : index
      %13 = vector.load %arg6[%c0_11, %c0_12] : memref<16x128xf32, #tpu.memory_space<vmem>>, vector<16x128xf32>
      tpu.vector_store %arg6[%c0_11, %c0_12], %12 {strides = array<i32>} : memref<16x128xf32, #tpu.memory_space<vmem>>, vector<16x128xf32>,
    } else {
    }
    %c0 = arith.constant 0 : index
    %c0_1 = arith.constant 0 : index
    %3 = vector.load %arg6[%c0, %c0_1] : memref<16x128xf32, #tpu.memory_space<vmem>>, vector<16x128xf32>
    %c0_2 = arith.constant 0 : index
    %c0_3 = arith.constant 0 : index
    %4 = vector.load %arg3[%c0_2, %c0_3] : memref<16x128xbf16, #tpu.memory_space<vmem>>, vector<16x128xbf16>
    %c0_4 = arith.constant 0 : index
    %c0_5 = arith.constant 0 : index
    %5 = vector.load %arg4[%c0_4, %c0_5] : memref<128x128xbf16, #tpu.memory_space<vmem>>, vector<128x128xbf16>
    %cst = arith.constant dense<0.000000e+00> : vector<16x128xf32>
    %6 = tpu.matmul %4, %5, %cst {dimension_numbers = #tpu.dot_dimension_numbers<[1], [0], [0], [1], [0, 0, 1, 1], [], []>} : vector<16x128xbf16>, vector<128x128xbf16>, vector<16x128xf32> -> vector<16x128xf32>
    %7 = arith.addf %3, %6 : vector<16x128xf32>
    %c0_6 = arith.constant 0 : index
    %c0_7 = arith.constant 0 : index
    %8 = vector.load %arg6[%c0_6, %c0_7] : memref<16x128xf32, #tpu.memory_space<vmem>>, vector<16x128xf32>
    tpu.vector_store %arg6[%c0_6, %c0_7], %7 {strides = array<i32>} : memref<16x128xf32, #tpu.memory_space<vmem>>, vector<16x128xf32>,
    %c0_i32_8 = arith.constant 0 : i32
    %9 = arith.cmpi eq, %arg2, %c0_i32_8 : i32
    %10 = arith.extui %9 : i1 to i32
    %c0_i32_9 = arith.constant 0 : i32
    %11 = arith.cmpi ne, %10, %c0_i32_9 : i32
    scf.if %11 {
      %c0_10 = arith.constant 0 : index
      %c0_11 = arith.constant 0 : index
      %12 = vector.load %arg6[%c0_10, %c0_11] : memref<16x128xf32, #tpu.memory_space<vmem>>, vector<16x128xf32>
      %c0_12 = arith.constant 0 : index
      %c0_13 = arith.constant 0 : index
      %13 = vector.load %arg5[%c0_12, %c0_13] : memref<16x128xf32, #tpu.memory_space<vmem>>, vector<16x128xf32>
      tpu.vector_store %arg5[%c0_12, %c0_13], %12 {strides = array<i32>} : memref<16x128xf32, #tpu.memory_space<vmem>>, vector<16x128xf32>,
    } else {
    }
    return
  }
  func.func @transform_0(%arg0: i32, %arg1: i32, %arg2: i32) -> (i32, i32) {
    %c0_i32 = arith.constant 0 : i32
    return %arg0, %arg2 : i32, i32
  }
  func.func @transform_1(%arg0: i32, %arg1: i32, %arg2: i32) -> (i32, i32) {
    %c0_i32 = arith.constant 0 : i32
    return %arg2, %arg1 : i32, i32
  }
  func.func @transform_2(%arg0: i32, %arg1: i32, %arg2: i32) -> (i32, i32) {
    %c0_i32 = arith.constant 0 : i32
    return %arg0, %arg1 : i32, i32
  }
}

</mosaic_0001>

<bundles_post_ra>
// kernel: tpu_custom_call.1
= control target key start
LH: loop header
LB: loop body
LE: loop exit
PB: predicated region body
PF: predicated region fallthrough
CT: control target
= control target key end

     0   :  { %7 = vsyncpa [#allocation4], 0  ;;  %s379_s0 = inlined_call_operand.hbm [shape: bf16[16,128], index: 0, kind: input, shape index: {}]   ;;  %s380_s1 = inlined_call_operand.hbm [shape: bf16[128,128], index: 1, kind: input, shape index: {}]   ;;  %s381_s2 = inlined_call_operand.hbm [shape: f32[16,128], index: 2, kind: output, shape index: {}]  }
   0x1   :  { %8 = vsyncpa [#allocation7], 0 }
   0x2   :  { %9 = vsyncpa [#allocation5], 0  ;;  %s319_s9 = smov [#allocation3]   ;;  %s247_s13 = scalar_lea.hbm %s379_s0, 128 }
   0x3   :  { %s15_s10 = sshll.u32 %s319_s9, 4  ;;  %p248_p0 = scmp.ne.s32.totalorder %s379_s0, %s247_s13  ;;  %s16_s10 = int_to_ptr.vmem [resolvable:$true] %s15_s10 }
   0x4   :  { %p251_p1 = scmp.lt.u32.totalorder %s247_s13, %s379_s0 }
   0x6   :  { %p253_p2 = pnand %p251_p1, %p248_p0 }
   0x8   :  { %256 = shalt.err (!%p253_p2)
}
   0x9   :  { %s257_s18 = scalar_lea.vmem %s16_s10, 128  ;;  %p262_p4 = scmp.lt.s32.totalorder %s16_s10, %s16_s10 }
   0xa   :  { %p258_p3 = scmp.ne.s32.totalorder %s16_s10, %s257_s18  ;;  %p263_p5 = scmp.lt.s32.totalorder %s257_s18, %s257_s18 }
   0xc   :  { %p264_p6 = por %p263_p5, %p262_p4 }
   0xe   :  { %p265_p7 = pnand %p264_p6, %p258_p3 }
  0x10   :  { %268 = shalt.err (!%p265_p7)
}
  0x11   :  { %s320_s19 = smov 64   ;;  %s321_s20 = smov 4  }
  0x12   :  { %21 = dma.hbm_to_vmem [thread:$0]  %s379_s0, 128, %s16_s10, [#allocation4], %s320_s19, %s320_s19, %s321_s20  }
  0x13   :  { %s322_s23 = smov [#allocation6]   ;;  %s269_s27 = scalar_lea.hbm %s380_s1, 1024 }
  0x14   :  { %s27_s24 = sshll.u32 %s322_s23, 4  ;;  %p270_p8 = scmp.ne.s32.totalorder %s380_s1, %s269_s27  ;;  %s28_s24 = int_to_ptr.vmem [resolvable:$true] %s27_s24 }
  0x15   :  { %p273_p9 = scmp.lt.u32.totalorder %s269_s27, %s380_s1 }
  0x17   :  { %p275_p10 = pnand %p273_p9, %p270_p8 }
  0x19   :  { %278 = shalt.err (!%p275_p10)
}
  0x1a   :  { %s279_s4 = scalar_lea.vmem %s28_s24, 1024  ;;  %p284_p12 = scmp.lt.s32.totalorder %s28_s24, %s28_s24 }
  0x1b   :  { %p280_p11 = scmp.ne.s32.totalorder %s28_s24, %s279_s4  ;;  %p285_p13 = scmp.lt.s32.totalorder %s279_s4, %s279_s4 }
  0x1d   :  { %p286_p0 = por %p285_p13, %p284_p12 }
  0x1f   :  { %p287_p1 = pnand %p286_p0, %p280_p11 }
  0x21   :  { %290 = shalt.err (!%p287_p1)
}
  0x22   :  { %33 = dma.hbm_to_vmem [thread:$0]  %s380_s1, 1024, %s28_s24, [#allocation7], %s320_s19, %s320_s19, %s321_s20  }
  0x23   :  { %313 = dma.done.wait [#allocation4], 128  }
  0x24   :  { %314 = vsyncadd [#allocation4], 4294967168 }
  0x25   :  { %315 = dma.done.wait [#allocation7], 1024  }
  0x26   :  { %316 = vsyncadd [#allocation7], 4294966272  ;;  %v323_v0 = vmov 0.0   ;;  %vm324_vm0 = vmmov 0   ;;  %v238_v1 = vld [vmem:[#allocation6] sm:$0xff]   ;;  %v239_v2 = vld [vmem:[#allocation6 + $0x8] sm:$0xff]  }
  0x27   :  { %209 = vmatprep.subr.bf16.mxu0 %v323_v0  ;;  %225 = vmatprep.mubr.msk.bf16.mxu0 %vm324_vm0, %v323_v0  ;;  %v240_v3 = vld [vmem:[#allocation6 + $0x10] sm:$0xff]   ;;  %v241_v4 = vld [vmem:[#allocation6 + $0x18] sm:$0xff]   ;;  %v242_v5 = vld [vmem:[#allocation6 + $0x20] sm:$0xff]   ;;  %s325_s1 = smov [#allocation8]  }
  0x28   :  { %210 = vmatpush3.bf16.msra.mxu0 %v238_v1  ;;  %v243_v6 = vld [vmem:[#allocation6 + $0x28] sm:$0xff]   ;;  %v244_v7 = vld [vmem:[#allocation6 + $0x30] sm:$0xff]   ;;  %v245_v8 = vld [vmem:[#allocation6 + $0x38] sm:$0xff]   ;;  %s178_s6 = sshll.u32 %s325_s1, 4  ;;  %s179_s6 = int_to_ptr.vmem [resolvable:$true] %s178_s6 }
  0x29   :  { %211 = vmatprep.subr.bf16.mxu0 %v323_v0  ;;  %v246_v9 = vld [vmem:[#allocation3] sm:$0xff]   ;;  %s291_s7 = scalar_lea.vmem %s179_s6, 256  ;;  %p296_p3 = scmp.lt.s32.totalorder %s179_s6, %s179_s6 }
  0x2a   :  { %p292_p2 = scmp.ne.s32.totalorder %s179_s6, %s291_s7  ;;  %p297_p4 = scmp.lt.s32.totalorder %s291_s7, %s291_s7 }
  0x2c   :  { %212 = vmatpush3.bf16.msra.mxu0 %v239_v2  ;;  %p298_p5 = por %p297_p4, %p296_p3 }
  0x2d   :  { %213 = vmatprep.subr.bf16.mxu0 %v323_v0 }
  0x2e   :  { %p299_p6 = pnand %p298_p5, %p292_p2 }
  0x30   :  { %214 = vmatpush3.bf16.msra.mxu0 %v240_v3 }
  0x31   :  { %215 = vmatprep.subr.bf16.mxu0 %v323_v0 }
  0x34   :  { %216 = vmatpush3.bf16.msra.mxu0 %v241_v4 }
  0x35   :  { %217 = vmatprep.subr.bf16.mxu0 %v323_v0 }
  0x38   :  { %218 = vmatpush3.bf16.msra.mxu0 %v242_v5 }
  0x39   :  { %219 = vmatprep.subr.bf16.mxu0 %v323_v0 }
  0x3c   :  { %220 = vmatpush3.bf16.msra.mxu0 %v243_v6 }
  0x3d   :  { %221 = vmatprep.subr.bf16.mxu0 %v323_v0 }
  0x40   :  { %222 = vmatpush3.bf16.msra.mxu0 %v244_v7 }
  0x41   :  { %223 = vmatprep.subr.bf16.mxu0 %v323_v0 }
  0x44   :  { %224 = vmatpush3.bf16.msra.mxu0 %v245_v8 }
  0x47   :  { %226 = vmatmul.mubr.bf16.vlgmr.msra.gmra.mrb[0].mxu0 %v246_v9 }
 0x11a   :  { %v155_v10 = vpop.f32.mrb[0].mxu0 }
 0x11b   :  { %171 = vst [vmem:[#allocation8] sm:$0xff] %v155_v10  ;;  %v227_v11 = vpop.f32.mrb[1].mxu0 }
 0x11c   :  { %v158_v12 = vpop.f32.mrb[2].mxu0 }
 0x11d   :  { %172 = vst [vmem:[#allocation8 + $0x8] sm:$0xff] %v158_v12  ;;  %v228_v13 = vpop.f32.mrb[3].mxu0 }
 0x11e   :  { %302 = shalt.err (!%p299_p6)
}
 0x11f   :  { %s303_s10 = scalar_lea.hbm %s381_s2, 256 }
 0x120   :  { %p304_p7 = scmp.ne.s32.totalorder %s381_s2, %s303_s10  ;;  %p307_p8 = scmp.lt.u32.totalorder %s303_s10, %s381_s2 }
 0x122   :  { %p309_p9 = pnand %p307_p8, %p304_p7 }
 0x124   :  { %312 = shalt.err (!%p309_p9)
}
 0x125   :  { %s326_s15 = smov 128   ;;  %s327_s16 = smov 8  }
 0x126   :  { %184 = dma.vmem_to_hbm [thread:$0]  %s179_s6, 256, %s381_s2, [#allocation5], %s326_s15, %s326_s15, %s327_s16  }
 0x127   :  { %317 = dma.done.wait [#allocation5], 256  }
 0x128   :  { %318 = vsyncadd [#allocation5], 4294967040 }
 0x129   :  { %188 = vsyncpa [#allocation4], 1 }
 0x12a   :  { %189 = vsyncpa [#allocation7], 1 }
 0x12b   :  { %190 = vsyncpa [#allocation5], 1 }

</bundles_post_ra>
